<compile_context>
chip_gen: v7x
topology: tpu7x:2x2x1
jax: 0.10.0
libtpu: 0.0.40
codegen_flags: <defaults>
</compile_context>

<pallas_src>
import functools

import jax
import jax.numpy as jnp
import numpy as np
from jax.experimental import pallas as pl
from jax.experimental.pallas import tpu as pltpu


def _blend_kernel(face_ref, bary_ref, attr_ref, out_ref):
    # face_ref: (1, 1, TP)   int32   packed face index, -1 = miss
    # bary_ref: (1, 3, TP)   f32     barycentric coords for K=0
    # attr_ref: (3D, BF)     f32/bf16 channel-major table, row index = v*D + c
    # out_ref : (1, D+1, TP) f32     channels 0..D-1 = blended attrs, channel D = vis mask
    d = out_ref.shape[1] - 1
    bf = attr_ref.shape[1]
    tp = out_ref.shape[2]

    face = face_ref[0]                                     # (1, TP) int32
    valid = face > -1                                      # (1, TP) bool

    # One-hot gather on the MXU: (3D, BF) @ (BF, TP) -> (3D, TP).
    # face == -1 never matches any row index, so invalid pixels get all-zero
    # columns — the reference's clamp + mask-to-zero is implicit.
    iota = jax.lax.broadcasted_iota(jnp.int32, (bf, tp), 0)
    onehot = (iota == face).astype(attr_ref.dtype)         # (BF, TP)
    g = jnp.dot(attr_ref[...], onehot,
                preferred_element_type=jnp.float32)        # (3D, TP) f32

    # Barycentric blend on the VPU (accumulation stays f32).
    bary = bary_ref[0]                                     # (3, TP)
    pv = (bary[0:1] * g[0:d]
          + bary[1:2] * g[d:2 * d]
          + bary[2:3] * g[2 * d:3 * d])                    # (D, TP)

    out_ref[0, 0:d, :] = pv.astype(out_ref.dtype)
    out_ref[0, d:d + 1, :] = valid.astype(out_ref.dtype)


@functools.partial(jax.jit, static_argnames=("tile_hw", "gather_in_bf16"))
def blend_shader(pix_to_face, bary_coords, attributes, *, tile_hw=4096,
                 gather_in_bf16=False):
    """Pallas BlendShader.forward.

    Args:
      pix_to_face: (N, H, W, K) int32, packed face indices, -1 = miss.
      bary_coords: (N, H, W, K, 3) float32.
      attributes:  (B, F, 3, D) float32 (per-face per-vertex attributes,
                   packed face index space is B*F — matches the PyTorch view()).
      tile_hw:     pixel (lane) tile; large by default to amortize grid-step overhead.
      gather_in_bf16: run the one-hot gather matmul in bf16 (v5e/v6e MXU fast path;
                   ≈1e-2 relative error vs the f32 reference).

    Returns:
      (N, D + 1, H, W) float32 (blended attributes + visibility channel), NCHW.
    """
    N, H, W, K = pix_to_face.shape
    D = attributes.shape[-1]
    BF = attributes.shape[0] * attributes.shape[1]
    HW = H * W
    tile_hw = min(tile_hw, HW)   # full-row block when the image is small

    # Cheap input-side glue: channel-major, pixels-on-lanes. No output-side
    # transpose/concat is needed — the kernel writes NC(HW) directly.
    face0 = pix_to_face[..., 0].reshape(N, 1, HW).astype(jnp.int32)            # (N,1,HW)
    bary0 = jnp.moveaxis(bary_coords[..., 0, :], -1, 1).reshape(N, 3, HW)
    bary0 = bary0.astype(jnp.float32)                                          # (N,3,HW)
    attr_t = attributes.reshape(BF, 3 * D).T.astype(jnp.float32)               # (3D,BF)
    if gather_in_bf16:
        attr_t = attr_t.astype(jnp.bfloat16)

    grid = (N, pl.cdiv(HW, tile_hw))
    out = pl.pallas_call(
        _blend_kernel,
        out_shape=jax.ShapeDtypeStruct((N, D + 1, HW), jnp.float32),
        grid=grid,
        in_specs=[
            pl.BlockSpec((1, 1, tile_hw), lambda n, j: (n, 0, j)),       # face indices
            pl.BlockSpec((1, 3, tile_hw), lambda n, j: (n, 0, j)),       # bary coords
            pl.BlockSpec((3 * D, BF), lambda n, j: (0, 0)),              # full attr table
        ],
        out_specs=pl.BlockSpec((1, D + 1, tile_hw), lambda n, j: (n, 0, j)),
        compiler_params=pltpu.CompilerParams(
            dimension_semantics=("parallel", "parallel")),
    )(face0, bary0, attr_t)

    return out.reshape(N, D + 1, H, W)                                         # free reshape


def blend_shader_ref(pix_to_face, bary_coords, attributes):
    """Pure-JAX mirror of the PyTorch forward (for correctness checking)."""
    N, H, W, K = pix_to_face.shape
    D = attributes.shape[-1]
    attr = attributes.reshape(-1, 3, D)                            # (B*F, 3, D)
    mask = pix_to_face == -1                                       # (N,H,W,K)
    p2f = jnp.where(mask, 0, pix_to_face)
    pfv = attr[p2f]                                                # (N,H,W,K,3,D)
    pv = (bary_coords[..., None] * pfv).sum(axis=-2)               # (N,H,W,K,D)
    pv = jnp.where(mask[..., None], 0.0, pv)
    pv0 = pv[:, :, :, 0].transpose(0, 3, 1, 2)                     # (N,D,H,W)
    vis = (pix_to_face > -1).astype(jnp.float32)[:, :, :, 0][:, None, :, :]
    return jnp.concatenate([pv0, vis], axis=1)


if __name__ == "__main__":
    key = jax.random.PRNGKey(0)
    k1, k2, k3 = jax.random.split(key, 3)

    # Small shapes consistent with the module's forward:
    N, H, W, K = 2, 16, 16, 4        # rasterizer output (K faces per pixel)
    B, F, D = 2, 32, 8               # attributes: (B, F, 3, D); packed face space = B*F

    pix_to_face = jax.random.randint(k1, (N, H, W, K), -1, B * F, dtype=jnp.int32)
    bary = jax.random.uniform(k2, (N, H, W, K, 3), dtype=jnp.float32) + 1e-3
    bary = bary / bary.sum(axis=-1, keepdims=True)                 # valid barycentrics
    attributes = jax.random.normal(k3, (B, F, 3, D), dtype=jnp.float32)

    ref = blend_shader_ref(pix_to_face, bary, attributes)

    # Exact (f32 gather) path.
    out = blend_shader(pix_to_face, bary, attributes)
    out = jax.block_until_ready(out)
    assert out.shape == (N, D + 1, H, W), out.shape
    np.testing.assert_allclose(np.asarray(out), np.asarray(ref), rtol=1e-5, atol=1e-5)

    # bf16 MXU fast path (v5e/v6e); looser tolerance due to bf16 attribute cast.
    out_bf16 = blend_shader(pix_to_face, bary, attributes, gather_in_bf16=True)
    out_bf16 = jax.block_until_ready(out_bf16)
    np.testing.assert_allclose(np.asarray(out_bf16), np.asarray(ref), rtol=1e-1, atol=1e-1)

    print("KERNEL_OK")
</pallas_src>

<mosaic_0001>
module attributes {stable_mosaic.version = 11 : i64} {
  func.func @_blend_kernel(%arg0: i32, %arg1: i32, %arg2: memref<1x1x256xi32, #tpu.memory_space<vmem>>, %arg3: memref<1x3x256xf32, #tpu.memory_space<vmem>>, %arg4: memref<24x64xf32, #tpu.memory_space<vmem>>, %arg5: memref<1x9x256xf32, #tpu.memory_space<vmem>>) attributes {dimension_semantics = [#tpu.dimension_semantics<parallel>, #tpu.dimension_semantics<parallel>], iteration_bounds = array<i64: 2, 1>, scalar_prefetch = 0 : i64, scratch_operands = 0 : i64, tpu.core_type = #tpu.core_type<tc>, window_params = [{transform_indices = @transform_0, window_bounds = array<i64: 1, 1, 256>}, {transform_indices = @transform_1, window_bounds = array<i64: 1, 3, 256>}, {pipeline_mode = #tpu.pipeline_mode<synchronous>, transform_indices = @transform_2, window_bounds = array<i64: 24, 64>}, {transform_indices = @transform_3, window_bounds = array<i64: 1, 9, 256>}]} {
    %c0 = arith.constant 0 : index
    %c0_0 = arith.constant 0 : index
    %c0_1 = arith.constant 0 : index
    %0 = vector.load %arg2[%c0, %c0_0, %c0_1] : memref<1x1x256xi32, #tpu.memory_space<vmem>>, vector<1x1x256xi32>
    %1 = vector.shape_cast %0 : vector<1x1x256xi32> to vector<1x256xi32>
    %c-1_i32 = arith.constant -1 : i32
    %2 = vector.broadcast %c-1_i32 : i32 to vector<1x256xi32>
    %3 = arith.cmpi sgt, %1, %2 : vector<1x256xi32>
    %4 = tpu.iota {dimensions = array<i32: 0>} : vector<64x256xi32>
    %5 = vector.broadcast %1 : vector<1x256xi32> to vector<64x256xi32>
    %6 = arith.cmpi eq, %4, %5 : vector<64x256xi32>
    %7 = arith.extui %6 : vector<64x256xi1> to vector<64x256xi32>
    %8 = arith.sitofp %7 : vector<64x256xi32> to vector<64x256xf32>
    %c0_2 = arith.constant 0 : index
    %c0_3 = arith.constant 0 : index
    %9 = vector.load %arg4[%c0_2, %c0_3] : memref<24x64xf32, #tpu.memory_space<vmem>>, vector<24x64xf32>
    %cst = arith.constant dense<0.000000e+00> : vector<24x256xf32>
    %10 = tpu.matmul %9, %8, %cst {dimension_numbers = #tpu.dot_dimension_numbers<[1], [0], [0], [1], [0, 0, 1, 1], [], []>} : vector<24x64xf32>, vector<64x256xf32>, vector<24x256xf32> -> vector<24x256xf32>
    %c0_4 = arith.constant 0 : index
    %c0_5 = arith.constant 0 : index
    %c0_6 = arith.constant 0 : index
    %11 = vector.load %arg3[%c0_4, %c0_5, %c0_6] : memref<1x3x256xf32, #tpu.memory_space<vmem>>, vector<1x3x256xf32>
    %12 = vector.shape_cast %11 : vector<1x3x256xf32> to vector<3x256xf32>
    %13 = vector.extract_strided_slice %12 {offsets = [0, 0], sizes = [1, 256], strides = [1, 1]} : vector<3x256xf32> to vector<1x256xf32>
    %14 = vector.extract_strided_slice %10 {offsets = [0, 0], sizes = [8, 256], strides = [1, 1]} : vector<24x256xf32> to vector<8x256xf32>
    %15 = vector.broadcast %13 : vector<1x256xf32> to vector<8x256xf32>
    %16 = arith.mulf %15, %14 : vector<8x256xf32>
    %17 = vector.extract_strided_slice %12 {offsets = [1, 0], sizes = [1, 256], strides = [1, 1]} : vector<3x256xf32> to vector<1x256xf32>
    %18 = vector.extract_strided_slice %10 {offsets = [8, 0], sizes = [8, 256], strides = [1, 1]} : vector<24x256xf32> to vector<8x256xf32>
    %19 = vector.broadcast %17 : vector<1x256xf32> to vector<8x256xf32>
    %20 = arith.mulf %19, %18 : vector<8x256xf32>
    %21 = arith.addf %16, %20 : vector<8x256xf32>
    %22 = vector.extract_strided_slice %12 {offsets = [2, 0], sizes = [1, 256], strides = [1, 1]} : vector<3x256xf32> to vector<1x256xf32>
    %23 = vector.extract_strided_slice %10 {offsets = [16, 0], sizes = [8, 256], strides = [1, 1]} : vector<24x256xf32> to vector<8x256xf32>
    %24 = vector.broadcast %22 : vector<1x256xf32> to vector<8x256xf32>
    %25 = arith.mulf %24, %23 : vector<8x256xf32>
    %26 = arith.addf %21, %25 : vector<8x256xf32>
    %c0_7 = arith.constant 0 : index
    %c0_8 = arith.constant 0 : index
    %c0_9 = arith.constant 0 : index
    %27 = vector.load %arg5[%c0_7, %c0_8, %c0_9] : memref<1x9x256xf32, #tpu.memory_space<vmem>>, vector<1x8x256xf32>
    %28 = vector.shape_cast %27 : vector<1x8x256xf32> to vector<8x256xf32>
    %29 = vector.shape_cast %26 : vector<8x256xf32> to vector<1x8x256xf32>
    tpu.vector_store %arg5[%c0_7, %c0_8, %c0_9], %29 {strides = array<i32>} : memref<1x9x256xf32, #tpu.memory_space<vmem>>, vector<1x8x256xf32>,
    %30 = arith.extui %3 : vector<1x256xi1> to vector<1x256xi32>
    %31 = arith.sitofp %30 : vector<1x256xi32> to vector<1x256xf32>
    %c0_10 = arith.constant 0 : index
    %c8 = arith.constant 8 : index
    %c0_11 = arith.constant 0 : index
    %32 = vector.load %arg5[%c0_10, %c8, %c0_11] : memref<1x9x256xf32, #tpu.memory_space<vmem>>, vector<1x1x256xf32>
    %33 = vector.shape_cast %32 : vector<1x1x256xf32> to vector<1x256xf32>
    %34 = vector.shape_cast %31 : vector<1x256xf32> to vector<1x1x256xf32>
    tpu.vector_store %arg5[%c0_10, %c8, %c0_11], %34 {strides = array<i32>} : memref<1x9x256xf32, #tpu.memory_space<vmem>>, vector<1x1x256xf32>,
    return
  }
  func.func @transform_0(%arg0: i32, %arg1: i32) -> (i32, i32, i32) {
    %c0_i32 = arith.constant 0 : i32
    %c0_i32_0 = arith.constant 0 : i32
    return %arg0, %c0_i32, %arg1 : i32, i32, i32
  }
  func.func @transform_1(%arg0: i32, %arg1: i32) -> (i32, i32, i32) {
    %c0_i32 = arith.constant 0 : i32
    %c0_i32_0 = arith.constant 0 : i32
    return %arg0, %c0_i32, %arg1 : i32, i32, i32
  }
  func.func @transform_2(%arg0: i32, %arg1: i32) -> (i32, i32) {
    %c0_i32 = arith.constant 0 : i32
    %c0_i32_0 = arith.constant 0 : i32
    %c0_i32_1 = arith.constant 0 : i32
    return %c0_i32, %c0_i32_0 : i32, i32
  }
  func.func @transform_3(%arg0: i32, %arg1: i32) -> (i32, i32, i32) {
    %c0_i32 = arith.constant 0 : i32
    %c0_i32_0 = arith.constant 0 : i32
    return %arg0, %c0_i32, %arg1 : i32, i32, i32
  }
}

</mosaic_0001>

<bundles_post_ra>
// kernel: squeeze.0
= control target key start
LH: loop header
LB: loop body
LE: loop exit
PB: predicated region body
PF: predicated region fallthrough
CT: control target
= control target key end

     0   :  { %s89_s8 = smov 112   ;;  %s90_s11 = smov 80   ;;  %vm3_vm0 = vcmask 130048   ;;  %vm9_vm1 = vcmask 1048448   ;;  %vm15_vm2 = vcmask 917248   ;;  %vm21_vm3 = vcmask 786048   ;;  %s142_s0 = inlined_call_operand.vmem [shape: s32[2,16,16], index: 0, kind: input, shape index: {}]   ;;  %s143_s1 = inlined_call_operand.vmem [shape: s32[2,1,256], index: 1, kind: output, shape index: {}]  }
   0x1   :  { %v72_v0 = vld [vmem:[%s142_s0 + $0x7] ss:$8 sm:$0xf]   ;;  %v74_v1 = vld [vmem:[%s142_s0 + $0x5] ss:$8 sm:$0xf]  }
   0x2   :  { %7 = vrot.lane.b32.xlu0 %v72_v0, %s89_s8  ;;  %19 = vrot.lane.b32.xlu1 %v74_v1, %s90_s11  ;;  %v73_v2 = vld [vmem:[%s142_s0 + $0x6] ss:$8 sm:$0xf]   ;;  %v75_v3 = vld [vmem:[%s142_s0 + $0x4] ss:$8 sm:$0xf]  }
   0x3   :  { %s91_s16 = smov 96   ;;  %v2_v4 = vld [vmem:[%s142_s0] ss:$8 sm:$0xf]   ;;  %s92_s19 = smov 64   ;;  %vm27_vm4 = vcmask 654848  }
   0x4   :  { %v76_v5 = vld [vmem:[%s142_s0 + $0x3] ss:$8 sm:$0xf]   ;;  %4 = vst.msk [vmem:[#allocation0] ss:$8 sm:$0xf] %vm3_vm0, %v2_v4  }
   0x5   :  { %v77_v6 = vld [vmem:[%s142_s0 + $0x2] ss:$8 sm:$0xf]   ;;  %s93_s24 = smov 48   ;;  %s94_s25 = smov 32   ;;  %vm33_vm5 = vcmask 523648  }
   0x6   :  { %13 = vrot.lane.b32.xlu0 %v73_v2, %s91_s16  ;;  %25 = vrot.lane.b32.xlu1 %v75_v3, %s92_s19  ;;  %v78_v7 = vld [vmem:[%s142_s0 + $0x1] ss:$8 sm:$0xf]   ;;  %s95_s0 = smov 16   ;;  %vm39_vm6 = vcmask 392448   ;;  %vm45_vm7 = vcmask 261248  }
   0xa   :  { %31 = vrot.lane.b32.xlu0 %v76_v5, %s93_s24  ;;  %37 = vrot.lane.b32.xlu1 %v77_v6, %s94_s25 }
   0xe   :  { %43 = vrot.lane.b32.xlu0 %v78_v7, %s95_s0 }
  0x74   :  { %v8_v8 = vpop.permute.xlu0 %7   ;;  %v20_v9 = vpop.permute.xlu1 %19  }
  0x75   :  { %10 = vst.msk [vmem:[#allocation0] ss:$8 sm:$0xf] %vm9_vm1, %v8_v8  }
  0x78   :  { %v14_v10 = vpop.permute.xlu0 %13   ;;  %v26_v11 = vpop.permute.xlu1 %25  }
  0x79   :  { %16 = vst.msk [vmem:[#allocation0] ss:$8 sm:$0xf] %vm15_vm2, %v14_v10  }
  0x7a   :  { %22 = vst.msk [vmem:[#allocation0] ss:$8 sm:$0xf] %vm21_vm3, %v20_v9  }
  0x7b   :  { %28 = vst.msk [vmem:[#allocation0] ss:$8 sm:$0xf] %vm27_vm4, %v26_v11  }
  0x7c   :  { %v32_v12 = vpop.permute.xlu0 %31   ;;  %v38_v13 = vpop.permute.xlu1 %37  }
  0x7d   :  { %34 = vst.msk [vmem:[#allocation0] ss:$8 sm:$0xf] %vm33_vm5, %v32_v12  }
  0x7e   :  { %40 = vst.msk [vmem:[#allocation0] ss:$8 sm:$0xf] %vm39_vm6, %v38_v13  }
  0x80   :  { %v44_v14 = vpop.permute.xlu0 %43  }
  0x81   :  { %46 = vst.msk [vmem:[#allocation0] ss:$8 sm:$0xf] %vm45_vm7, %v44_v14  }
  0x88   :  { %v50_v15 = vld [vmem:[#allocation0] sm:$0x1]  ;;  %v54_v16 = vld [vmem:[#allocation0 + $0x8] sm:$0x1]  ;;  %v59_v17 = vld [vmem:[#allocation0 + $0x10] sm:$0x1] }
  0x89   :  { %52 = vst [vmem:[%s143_s1] sm:$0x1] %v50_v15  ;;  %79 = vst [vmem:[%s143_s1 + $0x1] sm:$0x1] %v54_v16  ;;  %v65_v18 = vld [vmem:[#allocation0 + $0x18] sm:$0x1] }
  0x8a   :  { %80 = vst [vmem:[%s143_s1 + $0x2] sm:$0x1] %v59_v17  ;;  %81 = vst [vmem:[%s143_s1 + $0x3] sm:$0x1] %v65_v18 }

// kernel: blend_shader.1
= control target key start
LH: loop header
LB: loop body
LE: loop exit
PB: predicated region body
PF: predicated region fallthrough
CT: control target
= control target key end

     0   :  { %s732_s12 = smov 0   ;;  %s734_s13 = smov 0   ;;  %s823_s0 = inlined_call_operand.vmem [shape: s32[2,1,256], index: 0, kind: input, shape index: {}]   ;;  %s824_s1 = inlined_call_operand.vmem [shape: f32[2,3,256], index: 1, kind: input, shape index: {}]   ;;  %s825_s2 = inlined_call_operand.vmem [shape: f32[24,64], index: 2, kind: input, shape index: {}]   ;;  %s826_s3 = inlined_call_operand.vmem [shape: f32[2,9,256], index: 3, kind: output, shape index: {}]  }
   0x1   :  { %s736_s14 = smov 0  }
   0x2 LB: > { %s25_s15 = sadd.s32 1, %s704_s13  ;;  %p589_p0 = scmp.ge.s32.totalorder %s708_s14, 1  ;;  %s708_s14 = sphi %s736_s14, %s13_s14   ;;  %s704_s13 = sphi %s734_s13, %s828_s13   ;;  %s700_s12 = sphi %s732_s12, %s827_s12  }
   0x3   : > { %p27_p1 = scmp.ge.s32.totalorder %s25_s15, 2  ;;  %p174_p2 = scmp.lt.s32.totalorder %s708_s14, 3 }
   0x5   : > { %s830_s15 = smov (%p27_p1, %s25_s15), 0  ;;  %p175_p3 = pnand %p589_p0, %p174_p2 }
   0x6   : > { %p215_p4 = scmp.lt.s32.totalorder (!%p175_p3), %s700_s12, 1  ;;  %v245_v0 = vlaneseq (!%p175_p3)  ;;  %v710_v1 = vmov (!%p175_p3), 0.0   ;;  %v711_v14 = vmov (!%p175_p3), 1.0|1.0   ;;  %v310_v17 = vld [vmem:[%s825_s2] sm:$0xff] (!%p175_p3)  ;;  %v311_v18 = vld [vmem:[%s825_s2 + $0x8] sm:$0xff] (!%p175_p3) }
   0x7   : > { %178 = sbr.rel (%p175_p3) target bundleno = 260 (0x104), region = 32  ;;  %387 = vmatprep.mubr.f32.mxu0 (!%p175_p3), %v710_v1  ;;  %393 = vmatprep.mubr.f32.mxu1 (!%p175_p3), %v710_v1  ;;  %v312_v19 = vld [vmem:[%s825_s2 + $0x10] sm:$0xff] (!%p175_p3) }
   0x8   : > { %v755_v2 = vshrl.u32 (!%p175_p3), %v245_v0, 7 }
   0xa   : > { %v759_v3 = vsub.s32 (!%p175_p3), 1, %v755_v2  ;;  %v762_v4 = vsub.s32 (!%p175_p3), 0, %v755_v2  ;;  %v247_v5 = vadd.s32 (!%p175_p3), 8, %v755_v2  ;;  %v248_v7 = vadd.s32 (!%p175_p3), 16, %v755_v2 }
   0xb   : > { %v249_v8 = vadd.s32 (!%p175_p3), 24, %v755_v2  ;;  %v250_v9 = vadd.s32 (!%p175_p3), 32, %v755_v2  ;;  %v251_v12 = vadd.s32 (!%p175_p3), 40, %v755_v2  ;;  %v252_v15 = vadd.s32 (!%p175_p3), 48, %v755_v2 }
   0xc   : > { %v253_v16 = vadd.s32 (!%p175_p3), 56, %v755_v2  ;;  %v414_v21 = vsub.s32 (!%p175_p3), 4, %v755_v2  ;;  %v434_v22 = vsub.s32 (!%p175_p3), 5, %v755_v2  ;;  %v452_v25 = vsub.s32 (!%p175_p3), 2, %v755_v2 }
   0xd   : > { %v456_v28 = vsub.s32 (!%p175_p3), 6, %v755_v2 }
   0xe   : > { %s832_s12 = smov (!%p215_p4, %s700_s12), 1 }
   0xf   : > { %s590_s16 = sshll.u32 %s832_s12, 1  ;;  %s635_s26 = sshll.u32 %s832_s12, 5 }
  0x10   : > { %s221_s19 = scalar_lea.vmem %s823_s0, %s590_s16  ;;  %s794_s29 = scalar_lea.vmem %s826_s3, %s635_s26 }
  0x11   : > { %v243_v6 = vld [vmem:[%s221_s19] sm:$0x3]  ;;  %s634_s30 = sshll.u32 %s832_s12, 3 }
  0x12   : > { %v261_v10 = vrot.slane %v243_v6, %v759_v3  ;;  %v257_v11 = vrot.slane %v243_v6, %v762_v4  ;;  %vm244_vm0 = vcmp.gt.s32.totalorder %v243_v6, 4294967295  ;;  %s231_s6 = scalar_lea.vmem %s824_s1, %s634_s30 }
  0x13   : > { %v630_v13 = vsel %vm244_vm0, 1.0, %v710_v1  ;;  %v406_v20 = vld [vmem:[%s231_s6] sm:$0x77] }
  0x14   : > { %vm263_vm1 = vcmp.eq.s32.totalorder %v755_v2, %v261_v10  ;;  %vm265_vm2 = vcmp.eq.s32.totalorder %v247_v5, %v261_v10  ;;  %vm262_vm3 = vcmp.eq.s32.totalorder %v755_v2, %v257_v11  ;;  %vm264_vm4 = vcmp.eq.s32.totalorder %v247_v5, %v257_v11 }
  0x15   : > { %vm636_vm5 = vmpackc.low %vm265_vm2, %vm263_vm1  ;;  %vm267_vm6 = vcmp.eq.s32.totalorder %v248_v7, %v261_v10  ;;  %vm269_vm7 = vcmp.eq.s32.totalorder %v249_v8, %v261_v10  ;;  %vm266_vm8 = vcmp.eq.s32.totalorder %v248_v7, %v257_v11  ;;  %vm268_vm9 = vcmp.eq.s32.totalorder %v249_v8, %v257_v11 }
  0x16   : > { %637 = vmatprep.subr.msk.bf16.mxu0 %vm636_vm5, %v711_v14  ;;  %652 = vmatprep.subr.msk.bf16.mxu1 %vm636_vm5, %v711_v14  ;;  %vm638_vm10 = vmpackc.low %vm264_vm4, %vm262_vm3  ;;  %vm271_vm11 = vcmp.eq.s32.totalorder %v250_v9, %v261_v10  ;;  %vm273_vm12 = vcmp.eq.s32.totalorder %v251_v12, %v261_v10  ;;  %vm270_vm0 = vcmp.eq.s32.totalorder %v250_v9, %v257_v11 }
  0x17   : > { %639 = vmatpush1.bf16.msk.msra.mxu0 %vm638_vm10, %v711_v14  ;;  %656 = vmatpush1.bf16.msk.msra.mxu1 %vm638_vm10, %v711_v14  ;;  %vm640_vm13 = vmpackc.low %vm269_vm7, %vm267_vm6  ;;  %vm272_vm1 = vcmp.eq.s32.totalorder %v251_v12, %v257_v11  ;;  %vm275_vm2 = vcmp.eq.s32.totalorder %v252_v15, %v261_v10  ;;  %vm277_vm5 = vcmp.eq.s32.totalorder %v253_v16, %v261_v10 }
  0x18   : > { %641 = vmatprep.subr.msk.bf16.mxu0 %vm640_vm13, %v711_v14  ;;  %653 = vmatprep.subr.msk.bf16.mxu1 %vm640_vm13, %v711_v14  ;;  %vm642_vm14 = vmpackc.low %vm268_vm9, %vm266_vm8  ;;  %vm274_vm10 = vcmp.eq.s32.totalorder %v252_v15, %v257_v11  ;;  %vm276_vm6 = vcmp.eq.s32.totalorder %v253_v16, %v257_v11  ;;  %vm313_vm8 = vcmask 523264   ;;  %vm478_vm9 = vcmp.lt.s32.totalorder %v245_v0, 256 }
  0x19   : > { %vm644_vm15 = vmpackc.low %vm273_vm12, %vm271_vm11  ;;  %631 = vst.msk [vmem:[%s794_s29 + $0x10] ss:$8 sm:$0x3] %vm478_vm9, %v630_v13  ;;  %v411_v23 = vrot.slane %v406_v20, %v762_v4  ;;  %v431_v24 = vrot.slane %v406_v20, %v759_v3  ;;  %v415_v26 = vrot.slane %v406_v20, %v414_v21  ;;  %v435_v27 = vrot.slane %v406_v20, %v434_v22 }
  0x1a   : > { %vm646_vm3 = vmpackc.low %vm272_vm1, %vm270_vm0  ;;  %v453_v31 = vrot.slane %v406_v20, %v452_v25  ;;  %v457_v34 = vrot.slane %v406_v20, %v456_v28 }
  0x1b   : > { %643 = vmatpush1.bf16.msk.msra.mxu0 %vm642_vm14, %v711_v14  ;;  %657 = vmatpush1.bf16.msk.msra.mxu1 %vm642_vm14, %v711_v14  ;;  %vm648_vm4 = vmpackc.low %vm277_vm5, %vm275_vm2  ;;  %v421_v29 = vrot.slane %v411_v23, %v762_v4  ;;  %v441_v30 = vrot.slane %v431_v24, %v759_v3  ;;  %v425_v32 = vrot.slane %v415_v26, %v762_v4 }
  0x1c   : > { %645 = vmatprep.subr.msk.bf16.mxu0 %vm644_vm15, %v711_v14  ;;  %654 = vmatprep.subr.msk.bf16.mxu1 %vm644_vm15, %v711_v14  ;;  %vm650_vm7 = vmpackc.low %vm276_vm6, %vm274_vm10  ;;  %v445_v33 = vrot.slane %v435_v27, %v759_v3  ;;  %v463_v41 = vrot.slane %v453_v31, %v452_v25  ;;  %v467_v44 = vrot.slane %v457_v34, %v452_v25 }
  0x1f   : > { %647 = vmatpush1.bf16.msk.msra.mxu0 %vm646_vm3, %v711_v14  ;;  %658 = vmatpush1.bf16.msk.msra.mxu1 %vm646_vm3, %v711_v14 }
  0x20   : > { %649 = vmatprep.subr.msk.bf16.mxu0 %vm648_vm4, %v711_v14  ;;  %655 = vmatprep.subr.msk.bf16.mxu1 %vm648_vm4, %v711_v14 }
  0x23   : > { %651 = vmatpush1.bf16.msk.msra.mxu0 %vm650_vm7, %v711_v14  ;;  %659 = vmatpush1.bf16.msk.msra.mxu1 %vm650_vm7, %v711_v14 }
  0x26   : > { %627 = vmatmul.mubr.msk.f32.vlgmr.msra.gmra.mrb[0].mxu0 %vm313_vm8, %v310_v17  ;;  %628 = vmatmul.mubr.msk.f32.vlgmr.msra.gmra.mrb[0].mxu1 %vm313_vm8, %v311_v18 }
  0x27   : > { %399 = vmatprep.mubr.f32.mxu1 %v710_v1 }
  0x2a   : > { %629 = vmatmul.mubr.msk.f32.gmra.mrb[2].mxu1 %vm313_vm8, %v312_v19 }
  0xf9   : > { %v389_v35 = vpop.f32.mrb[0].mxu0  ;;  %v395_v36 = vpop.f32.mrb[0].mxu1 }
  0xfa   : > { %v426_v37 = vmul.f32 %v421_v29, %v389_v35  ;;  %v446_v38 = vmul.f32 %v441_v30, %v395_v36  ;;  %v391_v39 = vpop.f32.mrb[1].mxu0  ;;  %v397_v40 = vpop.f32.mrb[1].mxu1 }
  0xfb   : > { %v427_v42 = vmul.f32 %v425_v32, %v391_v39  ;;  %v447_v43 = vmul.f32 %v445_v33, %v397_v40 }
  0xfc   : > { %v448_v45 = vadd.f32 %v446_v38, %v426_v37 }
  0xfd   : > { %v449_v46 = vadd.f32 %v447_v43, %v427_v42  ;;  %v401_v47 = vpop.f32.mrb[2].mxu1 }
  0xfe   : > { %v468_v48 = vmul.f32 %v463_v41, %v401_v47  ;;  %v403_v49 = vpop.f32.mrb[3].mxu1 }
  0xff   : > { %v469_v50 = vmul.f32 %v467_v44, %v403_v49 }
 0x100   : > { %v470_v51 = vadd.f32 %v468_v48, %v448_v45 }
 0x101   : > { %v471_v52 = vadd.f32 %v469_v50, %v449_v46 }
 0x102   : > { %472 = vst [vmem:[%s794_s29] sm:$0xff] %v470_v51 }
 0x103   : > { %473 = vst [vmem:[%s794_s29 + $0x8] sm:$0xff] %v471_v52 }
 0x104 PF: > { %s13_s14 = sadd.s32 1, %s708_s14   ;;  %s827_s12 = smov %s704_s13 }
 0x105   : > { %p10_p5 = scmp.ge.s32.totalorder %s13_s14, 4   ;;  %s828_s13 = smov %s830_s15 }
 0x107   :  { %12 = sbr.rel (!%p10_p5) target bundleno = 2 (0x2), region = 66 }

</bundles_post_ra>
